<compile_context>
chip_gen: v7x
topology: tpu7x:2x2x1
jax: 0.10.0
libtpu: 0.0.40
codegen_flags: <defaults>
</compile_context>

<pallas_src>
import jax
import jax.numpy as jnp
from jax import lax
from jax.experimental import pallas as pl
from jax.experimental.pallas import tpu as pltpu

_BN_EPS = 1e-5


def _round_up(x, m):
    return ((x + m - 1) // m) * m


def _proj_body(x_ref, w1_ref, bn1_ref, w2_ref, bn2_ref, o_ref, acc_ref):
    k = pl.program_id(0)

    @pl.when(k == 0)
    def _():
        acc_ref[...] = jnp.zeros_like(acc_ref)

    # ---- Linear1, one output-feature tile: (B, D1p) @ (D1p, tk) on the MXU ----
    # No bias: it is cancelled exactly by BN1's batch-mean subtraction.
    h = jnp.dot(x_ref[...], w1_ref[...], preferred_element_type=jnp.float32)

    # ---- BatchNorm1d(D1) in training mode on this feature tile ----------------
    # Per-feature stats over the fully resident batch; affine folded to 1 FMA.
    mean1 = jnp.mean(h, axis=0, keepdims=True)
    c1 = h - mean1
    var1 = jnp.mean(c1 * c1, axis=0, keepdims=True)
    scale1 = bn1_ref[0:1, :] * lax.rsqrt(var1 + _BN_EPS)          # gamma1 row
    h = jnp.maximum(c1 * scale1 + bn1_ref[1:2, :], 0.0)           # + beta1, ReLU

    # ---- Linear2 partial product: accumulate (B, tk) @ (tk, D2p) in f32 -------
    acc_ref[...] += jnp.dot(h.astype(w2_ref.dtype), w2_ref[...],
                            preferred_element_type=jnp.float32)

    # ---- Finalize at the last K tile: BatchNorm1d(D2) (b2 also inert) ---------
    @pl.when(k == pl.num_programs(0) - 1)
    def _():
        z = acc_ref[...]
        mean2 = jnp.mean(z, axis=0, keepdims=True)
        c2 = z - mean2
        var2 = jnp.mean(c2 * c2, axis=0, keepdims=True)
        scale2 = bn2_ref[0:1, :] * lax.rsqrt(var2 + _BN_EPS)
        o_ref[...] = (c2 * scale2 + bn2_ref[1:2, :]).astype(o_ref.dtype)


def _make_kernel(acc_is_out):
    if acc_is_out:
        def kernel(x_ref, w1_ref, bn1_ref, w2_ref, bn2_ref, o_ref):
            _proj_body(x_ref, w1_ref, bn1_ref, w2_ref, bn2_ref, o_ref, o_ref)
    else:
        def kernel(x_ref, w1_ref, bn1_ref, w2_ref, bn2_ref, o_ref, acc_ref):
            _proj_body(x_ref, w1_ref, bn1_ref, w2_ref, bn2_ref, o_ref, acc_ref)
    return kernel


def _vmem_capacity_bytes():
    try:
        cap = int(pltpu.get_tpu_info().vmem_capacity_bytes)
        if cap > 0:
            return cap
    except Exception:
        pass
    return 64 * 1024 * 1024  # conservative (v7x-sized) fallback


def add_projection_forward(a, params, *, tile_k=None):
    """Projection-head forward. `a` is (B, mlp_dim) or (mlp_dim,)."""
    if a.ndim == 1:
        # NOTE: PyTorch BatchNorm1d raises for batch=1 in training mode; here the
        # output simply collapses to beta2 (var=0).  Kept for API parity.
        a = a[None, :]
    out_dtype = a.dtype
    B, D1 = a.shape
    D2 = params["w2"].shape[1]

    # Lane-dense feature padding: pad to 128 first, THEN pick the K tile as a
    # 128-multiple divisor of d1p (avoids padding W1 in both dims).
    d1p = _round_up(D1, 128)
    d2p = _round_up(D2, 128)

    acc_is_out = jnp.dtype(out_dtype) == jnp.dtype(jnp.float32)
    itemsize = jnp.dtype(out_dtype).itemsize
    bf, f32 = 2, 4

    vmem_cap = _vmem_capacity_bytes()
    vmem_ceiling = (vmem_cap * 3) // 4          # headroom for internal scratch
    margin = 4 << 20

    def footprint(tk):
        return (2 * B * d1p * bf                 # x (bf16, double buffered)
                + 2 * d1p * tk * bf              # w1 column-tile buffers
                + 2 * tk * d2p * bf              # w2 row-tile buffers
                + 2 * 8 * tk * f32               # bn1 tile (sublane-padded)
                + 2 * 8 * d2p * f32              # bn2 (resident)
                + 2 * B * d2p * itemsize         # output
                + (0 if acc_is_out else B * d2p * f32))   # acc scratch

    cands = [c for c in range(128, d1p + 1, 128) if d1p % c == 0]
    feasible = [c for c in cands if footprint(c) + margin <= vmem_ceiling]
    if not feasible:
        feasible = cands[:1]
    if tile_k is None:
        target = 1024 if vmem_cap >= (96 << 20) else 512
    else:
        target = max(128, _round_up(tile_k, 128))
    below = [c for c in feasible if c <= target]
    tk = max(below) if below else min(feasible)
    nk = d1p // tk

    vmem_limit = int(min(footprint(tk) + margin, vmem_ceiling))

    def pad2(x, r, c):
        return jnp.pad(x, ((0, r - x.shape[0]), (0, c - x.shape[1])))

    # bf16 matmul operands; merged BN affine params stay f32 (gamma row 0, beta row 1).
    x = pad2(a, B, d1p).astype(jnp.bfloat16)
    w1 = pad2(params["w1"], d1p, d1p).astype(jnp.bfloat16)
    w2 = pad2(params["w2"], d1p, d2p).astype(jnp.bfloat16)
    bn1 = pad2(jnp.concatenate([params["g1"], params["be1"]], axis=0)
               .astype(jnp.float32), 2, d1p)
    bn2 = pad2(jnp.concatenate([params["g2"], params["be2"]], axis=0)
               .astype(jnp.float32), 2, d2p)

    in_specs = [
        pl.BlockSpec((B, d1p), lambda k: (0, 0)),       # x   (resident)
        pl.BlockSpec((d1p, tk), lambda k: (0, k)),      # w1 column tile (streamed)
        pl.BlockSpec((2, tk), lambda k: (0, k)),        # gamma1/beta1 tile
        pl.BlockSpec((tk, d2p), lambda k: (k, 0)),      # w2 row tile (streamed)
        pl.BlockSpec((2, d2p), lambda k: (0, 0)),       # gamma2/beta2 (resident)
    ]
    out_spec = pl.BlockSpec((B, d2p), lambda k: (0, 0))  # resident across K
    scratch = [] if acc_is_out else [pltpu.VMEM((B, d2p), jnp.float32)]

    cost = pl.CostEstimate(
        flops=2 * B * d1p * (d1p + d2p),
        transcendentals=0,
        bytes_accessed=int(x.size * bf + w1.size * bf + w2.size * bf
                           + (bn1.size + bn2.size) * f32
                           + B * d2p * itemsize),
    )

    out = pl.pallas_call(
        _make_kernel(acc_is_out),
        out_shape=jax.ShapeDtypeStruct((B, d2p), out_dtype),
        grid_spec=pltpu.PrefetchScalarGridSpec(
            num_scalar_prefetch=0,
            grid=(nk,),
            in_specs=in_specs,
            out_specs=out_spec,
            scratch_shapes=scratch,
        ),
        compiler_params=pltpu.CompilerParams(
            dimension_semantics=("arbitrary",),   # K is a reduction axis
            vmem_limit_bytes=vmem_limit,
        ),
        cost_estimate=cost,
    )(x, w1, bn1, w2, bn2)

    return out[:, :D2]


def init_params(key, mlp_dim, embedding_size, dtype=jnp.float32):
    """PyTorch-default init: Linear U(-1/sqrt(fan_in), ..); BN gamma=1, beta=0.
    Weights stored as (in_features, out_features) so the kernel computes x @ W."""
    k1, k2, k3, k4 = jax.random.split(key, 4)
    bound = 1.0 / (mlp_dim ** 0.5)
    w1 = jax.random.uniform(k1, (mlp_dim, mlp_dim), dtype, -bound, bound)
    b1 = jax.random.uniform(k2, (1, mlp_dim), dtype, -bound, bound)
    w2 = jax.random.uniform(k3, (mlp_dim, embedding_size), dtype, -bound, bound)
    b2 = jax.random.uniform(k4, (1, embedding_size), dtype, -bound, bound)
    return {
        "w1": w1, "b1": b1,
        "g1": jnp.ones((1, mlp_dim), dtype), "be1": jnp.zeros((1, mlp_dim), dtype),
        "w2": w2, "b2": b2,
        "g2": jnp.ones((1, embedding_size), dtype),
        "be2": jnp.zeros((1, embedding_size), dtype),
    }


def _reference(a, p):
    """Pure-JAX f32 reference matching the PyTorch module forward (biases kept:
    they are cancelled by the batch-mean subtraction, proving the kernel's
    bias elimination is exact)."""
    h = a @ p["w1"] + p["b1"]
    m = h.mean(0, keepdims=True)
    v = ((h - m) ** 2).mean(0, keepdims=True)
    h = (h - m) / jnp.sqrt(v + _BN_EPS) * p["g1"] + p["be1"]
    h = jnp.maximum(h, 0.0)
    z = h @ p["w2"] + p["b2"]
    m2 = z.mean(0, keepdims=True)
    v2 = ((z - m2) ** 2).mean(0, keepdims=True)
    return (z - m2) / jnp.sqrt(v2 + _BN_EPS) * p["g2"] + p["be2"]


if __name__ == "__main__":
    key = jax.random.PRNGKey(0)

    # Case 1: small shapes (single grid step, heavy padding).
    B, MLP_DIM, EMB = 8, 32, 16
    kx, kp, key = jax.random.split(key, 3)
    x = jax.random.normal(kx, (B, MLP_DIM), jnp.float32)
    params = init_params(kp, MLP_DIM, EMB)
    out = jax.block_until_ready(add_projection_forward(x, params))
    ref = _reference(x, params)
    assert out.shape == (B, EMB), out.shape
    assert jnp.allclose(out, ref, atol=5e-2, rtol=5e-2), "mismatch (case 1)"

    # Case 2: larger hidden dim, non-128 embedding (exercises padding + tiling).
    B2, MLP2, EMB2 = 16, 384, 160
    kx2, kp2, key = jax.random.split(key, 3)
    x2 = jax.random.normal(kx2, (B2, MLP2), jnp.float32)
    params2 = init_params(kp2, MLP2, EMB2)
    out2 = jax.block_until_ready(add_projection_forward(x2, params2))
    ref2 = _reference(x2, params2)
    assert out2.shape == (B2, EMB2), out2.shape
    assert jnp.allclose(out2, ref2, atol=5e-2, rtol=5e-2), "mismatch (case 2)"

    # Case 3: force a multi-step K grid (tile_k=128 over d1p=384) to exercise
    # the accumulate-into-resident-output path and the init/finalize gating.
    out3 = jax.block_until_ready(add_projection_forward(x2, params2, tile_k=128))
    assert jnp.allclose(out3, ref2, atol=5e-2, rtol=5e-2), "mismatch (case 3)"

    print("KERNEL_OK")
</pallas_src>

<mosaic_0001>
module attributes {stable_mosaic.version = 11 : i64} {
  func.func @kernel(%arg0: i32, %arg1: memref<8x128xbf16, #tpu.memory_space<vmem>>, %arg2: memref<128x128xbf16, #tpu.memory_space<vmem>>, %arg3: memref<2x128xf32, #tpu.memory_space<vmem>>, %arg4: memref<128x128xbf16, #tpu.memory_space<vmem>>, %arg5: memref<2x128xf32, #tpu.memory_space<vmem>>, %arg6: memref<8x128xf32, #tpu.memory_space<vmem>>) attributes {dimension_semantics = [#tpu.dimension_semantics<arbitrary>], iteration_bounds = array<i64: 1>, scalar_prefetch = 0 : i64, scratch_operands = 0 : i64, tpu.core_type = #tpu.core_type<tc>, window_params = [{pipeline_mode = #tpu.pipeline_mode<synchronous>, transform_indices = @transform_0, window_bounds = array<i64: 8, 128>}, {transform_indices = @transform_1, window_bounds = array<i64: 128, 128>}, {transform_indices = @transform_2, window_bounds = array<i64: 2, 128>}, {transform_indices = @transform_3, window_bounds = array<i64: 128, 128>}, {pipeline_mode = #tpu.pipeline_mode<synchronous>, transform_indices = @transform_4, window_bounds = array<i64: 2, 128>}, {pipeline_mode = #tpu.pipeline_mode<synchronous>, transform_indices = @transform_5, window_bounds = array<i64: 8, 128>}]} {
    %c0_i32 = arith.constant 0 : i32
    %0 = arith.cmpi eq, %arg0, %c0_i32 : i32
    %1 = arith.extui %0 : i1 to i32
    %c0_i32_0 = arith.constant 0 : i32
    %2 = arith.cmpi ne, %1, %c0_i32_0 : i32
    scf.if %2 {
      %cst_22 = arith.constant 0.000000e+00 : f32
      %38 = vector.broadcast %cst_22 : f32 to vector<8x128xf32>
      %c0_23 = arith.constant 0 : index
      %c0_24 = arith.constant 0 : index
      %39 = vector.load %arg6[%c0_23, %c0_24] : memref<8x128xf32, #tpu.memory_space<vmem>>, vector<8x128xf32>
      tpu.vector_store %arg6[%c0_23, %c0_24], %38 {strides = array<i32>} : memref<8x128xf32, #tpu.memory_space<vmem>>, vector<8x128xf32>,
    } else {
    }
    %c0 = arith.constant 0 : index
    %c0_1 = arith.constant 0 : index
    %3 = vector.load %arg1[%c0, %c0_1] : memref<8x128xbf16, #tpu.memory_space<vmem>>, vector<8x128xbf16>
    %c0_2 = arith.constant 0 : index
    %c0_3 = arith.constant 0 : index
    %4 = vector.load %arg2[%c0_2, %c0_3] : memref<128x128xbf16, #tpu.memory_space<vmem>>, vector<128x128xbf16>
    %cst = arith.constant dense<0.000000e+00> : vector<8x128xf32>
    %5 = tpu.matmul %3, %4, %cst {dimension_numbers = #tpu.dot_dimension_numbers<[1], [0], [0], [1], [0, 0, 1, 1], [], []>} : vector<8x128xbf16>, vector<128x128xbf16>, vector<8x128xf32> -> vector<8x128xf32>
    %cst_4 = arith.constant dense<0.000000e+00> : vector<128xf32>
    %6 = vector.multi_reduction <add>, %5, %cst_4 [0] : vector<8x128xf32> to vector<128xf32>
    %7 = vector.shape_cast %6 : vector<128xf32> to vector<1x128xf32>
    %cst_5 = arith.constant 8.000000e+00 : f32
    %8 = vector.broadcast %cst_5 : f32 to vector<1x128xf32>
    %9 = arith.divf %7, %8 : vector<1x128xf32>
    %10 = vector.broadcast %9 : vector<1x128xf32> to vector<8x128xf32>
    %11 = arith.subf %5, %10 : vector<8x128xf32>
    %12 = arith.mulf %11, %11 : vector<8x128xf32>
    %cst_6 = arith.constant dense<0.000000e+00> : vector<128xf32>
    %13 = vector.multi_reduction <add>, %12, %cst_6 [0] : vector<8x128xf32> to vector<128xf32>
    %14 = vector.shape_cast %13 : vector<128xf32> to vector<1x128xf32>
    %cst_7 = arith.constant 8.000000e+00 : f32
    %15 = vector.broadcast %cst_7 : f32 to vector<1x128xf32>
    %16 = arith.divf %14, %15 : vector<1x128xf32>
    %c0_8 = arith.constant 0 : index
    %c0_9 = arith.constant 0 : index
    %17 = vector.load %arg3[%c0_8, %c0_9] : memref<2x128xf32, #tpu.memory_space<vmem>>, vector<1x128xf32>
    %cst_10 = arith.constant 9.99999974E-6 : f32
    %18 = vector.broadcast %cst_10 : f32 to vector<1x128xf32>
    %19 = arith.addf %16, %18 : vector<1x128xf32>
    %20 = math.rsqrt %19 : vector<1x128xf32>
    %21 = arith.mulf %17, %20 : vector<1x128xf32>
    %22 = vector.broadcast %21 : vector<1x128xf32> to vector<8x128xf32>
    %23 = arith.mulf %11, %22 : vector<8x128xf32>
    %c1 = arith.constant 1 : index
    %c0_11 = arith.constant 0 : index
    %24 = vector.load %arg3[%c1, %c0_11] : memref<2x128xf32, #tpu.memory_space<vmem>>, vector<1x128xf32>
    %25 = vector.broadcast %24 : vector<1x128xf32> to vector<8x128xf32>
    %26 = arith.addf %23, %25 : vector<8x128xf32>
    %cst_12 = arith.constant 0.000000e+00 : f32
    %27 = vector.broadcast %cst_12 : f32 to vector<8x128xf32>
    %28 = arith.maximumf %26, %27 : vector<8x128xf32>
    %c0_13 = arith.constant 0 : index
    %c0_14 = arith.constant 0 : index
    %29 = vector.load %arg6[%c0_13, %c0_14] : memref<8x128xf32, #tpu.memory_space<vmem>>, vector<8x128xf32>
    %30 = arith.truncf %28 : vector<8x128xf32> to vector<8x128xbf16>
    %c0_15 = arith.constant 0 : index
    %c0_16 = arith.constant 0 : index
    %31 = vector.load %arg4[%c0_15, %c0_16] : memref<128x128xbf16, #tpu.memory_space<vmem>>, vector<128x128xbf16>
    %cst_17 = arith.constant dense<0.000000e+00> : vector<8x128xf32>
    %32 = tpu.matmul %30, %31, %cst_17 {dimension_numbers = #tpu.dot_dimension_numbers<[1], [0], [0], [1], [0, 0, 1, 1], [], []>} : vector<8x128xbf16>, vector<128x128xbf16>, vector<8x128xf32> -> vector<8x128xf32>
    %33 = arith.addf %29, %32 : vector<8x128xf32>
    %c0_18 = arith.constant 0 : index
    %c0_19 = arith.constant 0 : index
    %34 = vector.load %arg6[%c0_18, %c0_19] : memref<8x128xf32, #tpu.memory_space<vmem>>, vector<8x128xf32>
    tpu.vector_store %arg6[%c0_18, %c0_19], %33 {strides = array<i32>} : memref<8x128xf32, #tpu.memory_space<vmem>>, vector<8x128xf32>,
    %c0_i32_20 = arith.constant 0 : i32
    %35 = arith.cmpi eq, %arg0, %c0_i32_20 : i32
    %36 = arith.extui %35 : i1 to i32
    %c0_i32_21 = arith.constant 0 : i32
    %37 = arith.cmpi ne, %36, %c0_i32_21 : i32
    scf.if %37 {
      %c0_22 = arith.constant 0 : index
      %c0_23 = arith.constant 0 : index
      %38 = vector.load %arg6[%c0_22, %c0_23] : memref<8x128xf32, #tpu.memory_space<vmem>>, vector<8x128xf32>
      %cst_24 = arith.constant dense<0.000000e+00> : vector<128xf32>
      %39 = vector.multi_reduction <add>, %38, %cst_24 [0] : vector<8x128xf32> to vector<128xf32>
      %40 = vector.shape_cast %39 : vector<128xf32> to vector<1x128xf32>
      %cst_25 = arith.constant 8.000000e+00 : f32
      %41 = vector.broadcast %cst_25 : f32 to vector<1x128xf32>
      %42 = arith.divf %40, %41 : vector<1x128xf32>
      %43 = vector.broadcast %42 : vector<1x128xf32> to vector<8x128xf32>
      %44 = arith.subf %38, %43 : vector<8x128xf32>
      %45 = arith.mulf %44, %44 : vector<8x128xf32>
      %cst_26 = arith.constant dense<0.000000e+00> : vector<128xf32>
      %46 = vector.multi_reduction <add>, %45, %cst_26 [0] : vector<8x128xf32> to vector<128xf32>
      %47 = vector.shape_cast %46 : vector<128xf32> to vector<1x128xf32>
      %cst_27 = arith.constant 8.000000e+00 : f32
      %48 = vector.broadcast %cst_27 : f32 to vector<1x128xf32>
      %49 = arith.divf %47, %48 : vector<1x128xf32>
      %c0_28 = arith.constant 0 : index
      %c0_29 = arith.constant 0 : index
      %50 = vector.load %arg5[%c0_28, %c0_29] : memref<2x128xf32, #tpu.memory_space<vmem>>, vector<1x128xf32>
      %cst_30 = arith.constant 9.99999974E-6 : f32
      %51 = vector.broadcast %cst_30 : f32 to vector<1x128xf32>
      %52 = arith.addf %49, %51 : vector<1x128xf32>
      %53 = math.rsqrt %52 : vector<1x128xf32>
      %54 = arith.mulf %50, %53 : vector<1x128xf32>
      %55 = vector.broadcast %54 : vector<1x128xf32> to vector<8x128xf32>
      %56 = arith.mulf %44, %55 : vector<8x128xf32>
      %c1_31 = arith.constant 1 : index
      %c0_32 = arith.constant 0 : index
      %57 = vector.load %arg5[%c1_31, %c0_32] : memref<2x128xf32, #tpu.memory_space<vmem>>, vector<1x128xf32>
      %58 = vector.broadcast %57 : vector<1x128xf32> to vector<8x128xf32>
      %59 = arith.addf %56, %58 : vector<8x128xf32>
      %c0_33 = arith.constant 0 : index
      %c0_34 = arith.constant 0 : index
      %60 = vector.load %arg6[%c0_33, %c0_34] : memref<8x128xf32, #tpu.memory_space<vmem>>, vector<8x128xf32>
      tpu.vector_store %arg6[%c0_33, %c0_34], %59 {strides = array<i32>} : memref<8x128xf32, #tpu.memory_space<vmem>>, vector<8x128xf32>,
    } else {
    }
    return
  }
  func.func @transform_0(%arg0: i32) -> (i32, i32) {
    %c0_i32 = arith.constant 0 : i32
    %c0_i32_0 = arith.constant 0 : i32
    %c0_i32_1 = arith.constant 0 : i32
    return %c0_i32, %c0_i32_0 : i32, i32
  }
  func.func @transform_1(%arg0: i32) -> (i32, i32) {
    %c0_i32 = arith.constant 0 : i32
    %c0_i32_0 = arith.constant 0 : i32
    return %c0_i32, %arg0 : i32, i32
  }
  func.func @transform_2(%arg0: i32) -> (i32, i32) {
    %c0_i32 = arith.constant 0 : i32
    %c0_i32_0 = arith.constant 0 : i32
    return %c0_i32, %arg0 : i32, i32
  }
  func.func @transform_3(%arg0: i32) -> (i32, i32) {
    %c0_i32 = arith.constant 0 : i32
    %c0_i32_0 = arith.constant 0 : i32
    return %arg0, %c0_i32 : i32, i32
  }
  func.func @transform_4(%arg0: i32) -> (i32, i32) {
    %c0_i32 = arith.constant 0 : i32
    %c0_i32_0 = arith.constant 0 : i32
    %c0_i32_1 = arith.constant 0 : i32
    return %c0_i32, %c0_i32_0 : i32, i32
  }
  func.func @transform_5(%arg0: i32) -> (i32, i32) {
    %c0_i32 = arith.constant 0 : i32
    %c0_i32_0 = arith.constant 0 : i32
    %c0_i32_1 = arith.constant 0 : i32
    return %c0_i32, %c0_i32_0 : i32, i32
  }
}

</mosaic_0001>

<bundles_post_ra>
// kernel: tpu_custom_call.1
= control target key start
LH: loop header
LB: loop body
LE: loop exit
PB: predicated region body
PF: predicated region fallthrough
CT: control target
= control target key end

     0   :  { %10 = vsyncpa [#allocation3], 0  ;;  %s666_s0 = inlined_call_operand.hbm [shape: bf16[8,128], index: 0, kind: input, shape index: {}]   ;;  %s667_s1 = inlined_call_operand.hbm [shape: bf16[128,128], index: 1, kind: input, shape index: {}]   ;;  %s668_s2 = inlined_call_operand.vmem [shape: f32[2,128], index: 2, kind: input, shape index: {}]   ;;  %s669_s3 = inlined_call_operand.hbm [shape: bf16[128,128], index: 3, kind: input, shape index: {}]   ;;  %s670_s4 = inlined_call_operand.vmem [shape: f32[2,128], index: 4, kind: input, shape index: {}]   ;;  %s671_s5 = inlined_call_operand.hbm [shape: f32[8,128], index: 5, kind: output, shape index: {}]  }
   0x1   :  { %11 = vsyncpa [#allocation6], 0 }
   0x2   :  { %12 = vsyncpa [#allocation4], 0  ;;  %s562_s18 = smov [#allocation5]   ;;  %s468_s22 = scalar_lea.hbm %s667_s1, 1024 }
   0x3   :  { %s28_s19 = sshll.u32 %s562_s18, 4  ;;  %p469_p0 = scmp.ne.s32.totalorder %s667_s1, %s468_s22  ;;  %s29_s19 = int_to_ptr.vmem [resolvable:$true] %s28_s19 }
   0x4   :  { %p472_p1 = scmp.lt.u32.totalorder %s468_s22, %s667_s1 }
   0x6   :  { %p474_p2 = pnand %p472_p1, %p469_p0 }
   0x8   :  { %477 = shalt.err (!%p474_p2)
}
   0x9   :  { %s478_s27 = scalar_lea.vmem %s29_s19, 1024  ;;  %p483_p4 = scmp.lt.s32.totalorder %s29_s19, %s29_s19 }
   0xa   :  { %p479_p3 = scmp.ne.s32.totalorder %s29_s19, %s478_s27  ;;  %p484_p5 = scmp.lt.s32.totalorder %s478_s27, %s478_s27 }
   0xc   :  { %p485_p6 = por %p484_p5, %p483_p4 }
   0xe   :  { %p486_p7 = pnand %p485_p6, %p479_p3 }
  0x10   :  { %489 = shalt.err (!%p486_p7)
}
  0x11   :  { %s563_s28 = smov 64   ;;  %s564_s29 = smov 4  }
  0x12   :  { %34 = dma.hbm_to_vmem [thread:$0]  %s667_s1, 1024, %s29_s19, [#allocation6], %s563_s28, %s563_s28, %s564_s29  }
  0x13   :  { %s565_s7 = smov [#allocation2]   ;;  %s566_s9 = smov [#allocation7]  }
  0x14   :  { %s19_s8 = sshll.u32 %s565_s7, 4  ;;  %s42_s10 = sshll.u32 %s566_s9, 4  ;;  %s20_s8 = int_to_ptr.vmem [resolvable:$true] %s19_s8  ;;  %s43_s10 = int_to_ptr.vmem [resolvable:$true] %s42_s10 }
  0x15   :  { %s490_s13 = scalar_lea.hbm %s666_s0, 64 }
  0x16   :  { %p491_p8 = scmp.ne.s32.totalorder %s666_s0, %s490_s13  ;;  %p494_p9 = scmp.lt.u32.totalorder %s490_s13, %s666_s0 }
  0x18   :  { %p496_p10 = pnand %p494_p9, %p491_p8 }
  0x1a   :  { %499 = shalt.err (!%p496_p10)
}
  0x1b   :  { %s500_s1 = scalar_lea.vmem %s20_s8, 64  ;;  %p505_p12 = scmp.lt.s32.totalorder %s20_s8, %s20_s8 }
  0x1c   :  { %p501_p11 = scmp.ne.s32.totalorder %s20_s8, %s500_s1  ;;  %p506_p13 = scmp.lt.s32.totalorder %s500_s1, %s500_s1 }
  0x1e   :  { %p507_p0 = por %p506_p13, %p505_p12 }
  0x20   :  { %p508_p1 = pnand %p507_p0, %p501_p11 }
  0x22   :  { %511 = shalt.err (!%p508_p1)
}
  0x23   :  { %22 = dma.hbm_to_vmem [thread:$0]  %s666_s0, 64, %s20_s8, [#allocation3]  }
  0x24   :  { %s512_s22 = scalar_lea.hbm %s669_s3, 1024 }
  0x25   :  { %p513_p2 = scmp.ne.s32.totalorder %s669_s3, %s512_s22  ;;  %p516_p3 = scmp.lt.u32.totalorder %s512_s22, %s669_s3 }
  0x27   :  { %p518_p4 = pnand %p516_p3, %p513_p2 }
  0x29   :  { %521 = shalt.err (!%p518_p4)
}
  0x2a   :  { %s522_s27 = scalar_lea.vmem %s43_s10, 1024  ;;  %p527_p6 = scmp.lt.s32.totalorder %s43_s10, %s43_s10 }
  0x2b   :  { %p523_p5 = scmp.ne.s32.totalorder %s43_s10, %s522_s27  ;;  %p528_p7 = scmp.lt.s32.totalorder %s522_s27, %s522_s27 }
  0x2d   :  { %p529_p8 = por %p528_p7, %p527_p6 }
  0x2f   :  { %p530_p9 = pnand %p529_p8, %p523_p5 }
  0x31   :  { %533 = shalt.err (!%p530_p9)
}
  0x32   :  { %48 = dma.hbm_to_vmem [thread:$0]  %s669_s3, 1024, %s43_s10, [#allocation6], %s563_s28, %s563_s28, %s564_s29  }
  0x33   :  { %556 = dma.done.wait [#allocation3], 64  }
  0x34   :  { %557 = vsyncadd [#allocation3], 4294967232 }
  0x35   :  { %558 = dma.done.wait [#allocation6], 2048  }
  0x36   :  { %559 = vsyncadd [#allocation6], 4294965248  ;;  %v567_v0 = vmov 0.0   ;;  %vm568_vm0 = vmmov 0   ;;  %v448_v1 = vld [vmem:[#allocation5] sm:$0xff]   ;;  %v449_v2 = vld [vmem:[#allocation5 + $0x8] sm:$0xff]   ;;  %v192_v39 = vlaneseq }
  0x37   :  { %400 = vmatprep.subr.bf16.mxu0 %v567_v0  ;;  %416 = vmatprep.mubr.msk.bf16.mxu0 %vm568_vm0, %v567_v0  ;;  %v450_v3 = vld [vmem:[#allocation5 + $0x10] sm:$0xff]   ;;  %v451_v4 = vld [vmem:[#allocation5 + $0x18] sm:$0xff]   ;;  %v452_v5 = vld [vmem:[#allocation5 + $0x20] sm:$0xff]   ;;  %s569_s10 = smov [#allocation8]  }
  0x38   :  { %420 = vmatprep.subr.bf16.mxu1 %v567_v0  ;;  %436 = vmatprep.mubr.msk.bf16.mxu1 %vm568_vm0, %v567_v0  ;;  %v453_v6 = vld [vmem:[#allocation5 + $0x28] sm:$0xff]   ;;  %v454_v7 = vld [vmem:[#allocation5 + $0x30] sm:$0xff]   ;;  %v455_v8 = vld [vmem:[#allocation5 + $0x38] sm:$0xff]   ;;  %v193_v40 = vshrl.u32 %v192_v39, 7  ;;  %s354_s11 = sshll.u32 %s569_s10, 4  ;;  %s355_s11 = int_to_ptr.vmem [resolvable:$true] %s354_s11 }
  0x39   :  { %401 = vmatpush3.bf16.msra.mxu0 %v448_v1  ;;  %v66_v9 = vld [vmem:[#allocation2] sm:$0xf]  ;;  %v456_v10 = vld [vmem:[#allocation7] sm:$0xff]   ;;  %v457_v11 = vld [vmem:[#allocation7 + $0x8] sm:$0xff]   ;;  %s534_s12 = scalar_lea.vmem %s355_s11, 128  ;;  %p539_p11 = scmp.lt.s32.totalorder %s355_s11, %s355_s11 }
  0x3a   :  { %402 = vmatprep.subr.bf16.mxu0 %v567_v0  ;;  %421 = vmatpush3.bf16.msra.mxu1 %v456_v10  ;;  %v458_v12 = vld [vmem:[#allocation7 + $0x10] sm:$0xff]   ;;  %v459_v13 = vld [vmem:[#allocation7 + $0x18] sm:$0xff]   ;;  %v460_v14 = vld [vmem:[#allocation7 + $0x20] sm:$0xff]   ;;  %v194_v42 = vsub.s32 0, %v193_v40  ;;  %p535_p10 = scmp.ne.s32.totalorder %s355_s11, %s534_s12  ;;  %p540_p12 = scmp.lt.s32.totalorder %s534_s12, %s534_s12 }
  0x3b   :  { %422 = vmatprep.subr.bf16.mxu1 %v567_v0  ;;  %v461_v15 = vld [vmem:[#allocation7 + $0x28] sm:$0xff]   ;;  %v462_v16 = vld [vmem:[#allocation7 + $0x30] sm:$0xff]   ;;  %v463_v17 = vld [vmem:[#allocation7 + $0x38] sm:$0xff]  }
  0x3c   :  { %v188_v41 = vld [vmem:[%s668_s2] sm:$0x1]  ;;  %v372_v46 = vld [vmem:[%s668_s2 + $0x1] ss:$0 sm:$0xff]  ;;  %p541_p13 = por %p540_p12, %p539_p11 }
  0x3d   :  { %403 = vmatpush3.bf16.msra.mxu0 %v449_v2 }
  0x3e   :  { %404 = vmatprep.subr.bf16.mxu0 %v567_v0  ;;  %423 = vmatpush3.bf16.msra.mxu1 %v457_v11  ;;  %p542_p0 = pnand %p541_p13, %p535_p10 }
  0x3f   :  { %424 = vmatprep.subr.bf16.mxu1 %v567_v0 }
  0x41   :  { %405 = vmatpush3.bf16.msra.mxu0 %v450_v3 }
  0x42   :  { %406 = vmatprep.subr.bf16.mxu0 %v567_v0  ;;  %425 = vmatpush3.bf16.msra.mxu1 %v458_v12  ;;  %v381_v12 = vld [vmem:[%s670_s4 + $0x1] ss:$0 sm:$0xff] }
  0x43   :  { %426 = vmatprep.subr.bf16.mxu1 %v567_v0 }
  0x45   :  { %407 = vmatpush3.bf16.msra.mxu0 %v451_v4 }
  0x46   :  { %408 = vmatprep.subr.bf16.mxu0 %v567_v0  ;;  %427 = vmatpush3.bf16.msra.mxu1 %v459_v13 }
  0x47   :  { %428 = vmatprep.subr.bf16.mxu1 %v567_v0 }
  0x49   :  { %409 = vmatpush3.bf16.msra.mxu0 %v452_v5 }
  0x4a   :  { %410 = vmatprep.subr.bf16.mxu0 %v567_v0  ;;  %429 = vmatpush3.bf16.msra.mxu1 %v460_v14 }
  0x4b   :  { %430 = vmatprep.subr.bf16.mxu1 %v567_v0 }
  0x4d   :  { %411 = vmatpush3.bf16.msra.mxu0 %v453_v6 }
  0x4e   :  { %412 = vmatprep.subr.bf16.mxu0 %v567_v0  ;;  %431 = vmatpush3.bf16.msra.mxu1 %v461_v15 }
  0x4f   :  { %432 = vmatprep.subr.bf16.mxu1 %v567_v0 }
  0x51   :  { %413 = vmatpush3.bf16.msra.mxu0 %v454_v7 }
  0x52   :  { %414 = vmatprep.subr.bf16.mxu0 %v567_v0  ;;  %433 = vmatpush3.bf16.msra.mxu1 %v462_v16 }
  0x53   :  { %434 = vmatprep.subr.bf16.mxu1 %v567_v0 }
  0x55   :  { %415 = vmatpush3.bf16.msra.mxu0 %v455_v8  ;;  %v332_v8 = vld [vmem:[%s670_s4] sm:$0x1] }
  0x56   :  { %435 = vmatpush3.bf16.msra.mxu1 %v463_v17 }
  0x58   :  { %417 = vmatmul.mubr.bf16.vlgmr.msra.gmra.mrb[0].mxu0 %v66_v9 }
 0x12b   :  { %v165_v18 = vpop.f32.mrb[0].mxu0 }
 0x12c   :  { %v171_v19 = vrot.slane %v165_v18, 4  ;;  %v418_v20 = vpop.f32.mrb[1].mxu0 }
 0x12d   :  { %v168_v21 = vpop.f32.mrb[2].mxu0 }
 0x12e   :  { %v172_v22 = vadd.f32 %v171_v19, %v165_v18  ;;  %v419_v23 = vpop.f32.mrb[3].mxu0 }
 0x130   :  { %v173_v24 = vrot.slane %v172_v22, 2 }
 0x132   :  { %v174_v25 = vadd.f32 %v173_v24, %v172_v22 }
 0x134   :  { %v175_v26 = vrot.slane %v174_v25, 1 }
 0x136   :  { %v176_v27 = vadd.f32 %v175_v26, %v174_v25 }
 0x138   :  { %v178_v28 = vmul.f32 0.125, %v176_v27 }
 0x13a   :  { %v179_v29 = vsub.f32 %v165_v18, %v178_v28 }
 0x13c   :  { %v180_v30 = vmul.f32 %v179_v29, %v179_v29 }
 0x13e   :  { %v181_v31 = vrot.slane %v180_v30, 4 }
 0x140   :  { %v182_v32 = vadd.f32 %v181_v31, %v180_v30 }
 0x142   :  { %v183_v33 = vrot.slane %v182_v32, 2 }
 0x144   :  { %v184_v34 = vadd.f32 %v183_v33, %v182_v32 }
 0x146   :  { %v185_v35 = vrot.slane %v184_v34, 1 }
 0x148   :  { %v186_v36 = vadd.f32 %v185_v35, %v184_v34 }
 0x14a   :  { %v187_v37 = vmul.f32 0.125, %v186_v36 }
 0x14c   :  { %v189_v38 = vadd.f32 1e-05, %v187_v37 }
 0x14e   :  { %464 = vrsqrt.f32 %v189_v38 }
 0x158   :  { %v465_v43 = vpop.eup %464 }
 0x159   :  { %v191_v44 = vmul.f32 %v465_v43, %v188_v41 }
 0x15b   :  { %v195_v45 = vrot.slane %v191_v44, %v194_v42 }
 0x15d   :  { %v196_v47 = vmul.f32 %v195_v45, %v179_v29 }
 0x15f   :  { %v202_v48 = vadd.f32 %v372_v46, %v196_v47 }
 0x161   :  { %v203_v49 = vmax.f32 %v202_v48, 0.0 }
 0x163   :  { %v205_v50 = vpack.c.bf16 %v203_v49, %v203_v49 }
 0x165   :  { %437 = vmatmul.mubr.bf16.vlgmr.msra.gmra.mrb[0].mxu1 %v205_v50 }
 0x238   :  { %v304_v51 = vpop.f32.mrb[0].mxu1 }
 0x239   :  { %v438_v52 = vpop.f32.mrb[1].mxu1  ;;  %v316_v55 = vrot.slane %v304_v51, 4 }
 0x23a   :  { %v307_v53 = vpop.f32.mrb[2].mxu1 }
 0x23b   :  { %v439_v54 = vpop.f32.mrb[3].mxu1  ;;  %v317_v56 = vadd.f32 %v316_v55, %v304_v51 }
 0x23d   :  { %v318_v57 = vrot.slane %v317_v56, 2 }
 0x23f   :  { %v319_v58 = vadd.f32 %v318_v57, %v317_v56 }
 0x241   :  { %v320_v59 = vrot.slane %v319_v58, 1 }
 0x243   :  { %v321_v60 = vadd.f32 %v320_v59, %v319_v58 }
 0x245   :  { %v322_v61 = vmul.f32 0.125, %v321_v60 }
 0x247   :  { %v323_v62 = vsub.f32 %v304_v51, %v322_v61 }
 0x249   :  { %v324_v63 = vmul.f32 %v323_v62, %v323_v62 }
 0x24b   :  { %v325_v0 = vrot.slane %v324_v63, 4 }
 0x24d   :  { %v326_v1 = vadd.f32 %v325_v0, %v324_v63 }
 0x24f   :  { %v327_v2 = vrot.slane %v326_v1, 2 }
 0x251   :  { %v328_v3 = vadd.f32 %v327_v2, %v326_v1 }
 0x253   :  { %v329_v4 = vrot.slane %v328_v3, 1 }
 0x255   :  { %v330_v5 = vadd.f32 %v329_v4, %v328_v3 }
 0x257   :  { %v331_v6 = vmul.f32 0.125, %v330_v5 }
 0x259   :  { %v333_v7 = vadd.f32 1e-05, %v331_v6 }
 0x25b   :  { %466 = vrsqrt.f32 %v333_v7 }
 0x265   :  { %v467_v9 = vpop.eup %466 }
 0x266   :  { %v335_v10 = vmul.f32 %v467_v9, %v332_v8 }
 0x268   :  { %v339_v11 = vrot.slane %v335_v10, %v194_v42 }
 0x26a   :  { %v340_v13 = vmul.f32 %v339_v11, %v323_v62 }
 0x26c   :  { %v346_v14 = vadd.f32 %v381_v12, %v340_v13 }
 0x26e   :  { %347 = vst [vmem:[#allocation8] sm:$0xff] %v346_v14 }
 0x26f   :  { %545 = shalt.err (!%p542_p0)
}
 0x270   :  { %s546_s15 = scalar_lea.hbm %s671_s5, 128 }
 0x271   :  { %p547_p1 = scmp.ne.s32.totalorder %s671_s5, %s546_s15  ;;  %p550_p2 = scmp.lt.u32.totalorder %s546_s15, %s671_s5 }
 0x273   :  { %p552_p3 = pnand %p550_p2, %p547_p1 }
 0x275   :  { %555 = shalt.err (!%p552_p3)
}
 0x276   :  { %357 = dma.vmem_to_hbm [thread:$0]  %s355_s11, 128, %s671_s5, [#allocation4]  }
 0x277   :  { %560 = dma.done.wait [#allocation4], 128  }
 0x278   :  { %561 = vsyncadd [#allocation4], 4294967168 }
 0x279   :  { %361 = vsyncpa [#allocation3], 1 }
 0x27a   :  { %362 = vsyncpa [#allocation6], 1 }
 0x27b   :  { %363 = vsyncpa [#allocation4], 1 }

</bundles_post_ra>
